<compile_context>
chip_gen: v7x
topology: tpu7x:2x2x1
jax: 0.10.0
libtpu: 0.0.40
codegen_flags: <defaults>
</compile_context>

<pallas_src>
import functools

import jax
import jax.numpy as jnp
from jax.experimental import pallas as pl
from jax.experimental.pallas import tpu as pltpu

BN_EPS = 1e-5
LANE = 128


def _round_up(x, m):
    return (x + m - 1) // m * m


def _pad2d(a, rows, cols):
    r, c = a.shape
    return jnp.pad(a, ((0, rows - r), (0, cols - c)))


# --------------------------------------------------------------------------
# Kernel
# --------------------------------------------------------------------------
def vae_kernel(
    x_ref, eps_ref,
    we_ref, be_ref,          # encoder Linear with BN folded in
    wh_ref, bh_ref,          # fused [mu | logvar] heads
    wd_ref, bd_ref,          # decoder Linear with BN folded in
    wf_ref, bf_ref,          # final Linear
    xo_ref, lat_ref,         # outputs: reconstruction (bf16), packed latent slab (fp32)
    *, z_pad,
):
    # ---- encoder: Linear(+folded BN) -> ReLU ----
    h = jnp.dot(x_ref[...], we_ref[...], preferred_element_type=jnp.float32)
    h = jnp.maximum(h + be_ref[...], 0.0)

    # ---- fused mu/logvar heads: one MXU push, lane-dense intermediate ----
    head = jnp.dot(h.astype(wh_ref.dtype), wh_ref[...],
                   preferred_element_type=jnp.float32) + bh_ref[...]
    # Store the head slab immediately: shortens the fp32 (tb x 2*z_pad)
    # live range across the two downstream matmuls.
    lat_ref[:, : 2 * z_pad] = head

    mu = head[:, :z_pad]
    lv = head[:, z_pad:]

    # ---- reparameterization: z = mu + sigma * eps ----
    z = mu + jnp.exp(0.5 * lv) * eps_ref[...]
    lat_ref[:, 2 * z_pad:] = z

    # ---- decoder: Linear(+folded BN) -> ReLU ----
    d = jnp.dot(z.astype(wd_ref.dtype), wd_ref[...],
                preferred_element_type=jnp.float32)
    d = jnp.maximum(d + bd_ref[...], 0.0)

    # ---- final: Linear -> ReLU, stored in output dtype (bf16) ----
    xo = jnp.dot(d.astype(wf_ref.dtype), wf_ref[...],
                 preferred_element_type=jnp.float32) + bf_ref[...]
    xo_ref[...] = jnp.maximum(xo, 0.0).astype(xo_ref.dtype)


# --------------------------------------------------------------------------
# One-time weight preparation (hoisted out of the per-call path)
# --------------------------------------------------------------------------
def prepare_params(params):
    """BN folding, head fusion, lane padding, bf16 casts. Call once & cache."""
    n_in, n_hidden = params["We"].shape
    z_dim = params["Wmu"].shape[1]

    # Trace-time BatchNorm folding (eval mode, running stats).
    se = params["ge"] * jax.lax.rsqrt(params["ve"] + BN_EPS)
    We = params["We"] * se
    be = (params["be"] - params["me"]) * se + params["bte"]
    sd = params["gd"] * jax.lax.rsqrt(params["vd"] + BN_EPS)
    Wd = params["Wd"] * sd
    bd = (params["bd"] - params["md"]) * sd + params["btd"]

    n_in_p = _round_up(n_in, LANE)
    n_hid_p = _round_up(n_hidden, LANE)
    z_pad = _round_up(z_dim, LANE)

    we_p = _pad2d(We, n_in_p, n_hid_p).astype(jnp.bfloat16)
    be_p = _pad2d(be, 1, n_hid_p).astype(jnp.float32)
    wh = jnp.concatenate(
        [_pad2d(params["Wmu"], n_hidden, z_pad),
         _pad2d(params["Wlv"], n_hidden, z_pad)], axis=1)
    wh_p = _pad2d(wh, n_hid_p, 2 * z_pad).astype(jnp.bfloat16)
    bh_p = jnp.concatenate(
        [_pad2d(params["bmu"], 1, z_pad),
         _pad2d(params["blv"], 1, z_pad)], axis=1).astype(jnp.float32)
    wd_p = _pad2d(Wd, z_pad, n_hid_p).astype(jnp.bfloat16)
    bd_p = _pad2d(bd, 1, n_hid_p).astype(jnp.float32)
    wf_p = _pad2d(params["Wf"], n_hid_p, n_in_p).astype(jnp.bfloat16)
    bf_p = _pad2d(params["bf"], 1, n_in_p).astype(jnp.float32)

    weights = (we_p, be_p, wh_p, bh_p, wd_p, bd_p, wf_p, bf_p)
    return dict(weights=weights,
                dims=(n_in, n_hidden, z_dim),
                pads=(n_in_p, n_hid_p, z_pad))


# --------------------------------------------------------------------------
# Generation-aware tiling / VMEM budgeting
# --------------------------------------------------------------------------
def _vmem_budget_bytes():
    try:
        cap = int(pltpu.get_tpu_info().vmem_capacity_bytes)
    except Exception:
        cap = 64 << 20  # conservative fallback: v7x per-TC physical VMEM
    # Headroom for Mosaic internal scratch / compiler temporaries.
    return max(cap - (12 << 20), 16 << 20)


def _select_batch_tile(B, batch_tile, n_in_p, n_hid_p, z_pad, param_bytes, budget):
    n_tiles = max(pl.cdiv(B, batch_tile), 1)
    # Guarantee >=2 grid steps for larger batches so dimension_semantics
    # ("parallel",) actually shards across both TensorCores on dual-TC chips.
    if n_tiles == 1 and B >= 2 * LANE:
        n_tiles = 2
    if B >= LANE:
        # Tile that divides B most tightly (minimal padded rows), lane-rounded.
        tb = _round_up(pl.cdiv(B, n_tiles), LANE)
    else:
        tb = _round_up(B, 16)  # keep bf16 sublane packing full for tiny B

    def vmem_need(t):
        # per-step streamed tiles (double-buffered): bf16 x, f32 eps, bf16 xo, f32 lat
        per_step = t * (2 * n_in_p + 4 * z_pad + 2 * n_in_p + 12 * z_pad)
        # fp32 in-kernel intermediates: h, d, head(2*z_pad), z, pre-ReLU xo
        inter = 4 * t * (2 * n_hid_p + 3 * z_pad + n_in_p)
        # single-buffered resident weights
        return param_bytes + 2 * per_step + inter

    # Shrink the batch tile (never the model dims) only if the budget demands it.
    while tb > LANE and vmem_need(tb) > budget:
        tb = _round_up(max(tb // 2, LANE), LANE)
    return tb, vmem_need(tb)


# --------------------------------------------------------------------------
# Forward wrapper
# --------------------------------------------------------------------------
def vae_forward(x, eps, prepared, *, batch_tile=512, out_dtype=jnp.bfloat16):
    """x: (B, 1, n_in) or (B, n_in); eps: (B, z_dim); prepared: prepare_params(...)."""
    weights = prepared["weights"]
    n_in, n_hidden, z_dim = prepared["dims"]
    n_in_p, n_hid_p, z_pad = prepared["pads"]

    # torch.squeeze(input['x']) -- but keep the batch dim even when B == 1.
    X = x[:, 0, :] if (x.ndim == 3 and x.shape[1] == 1) else x
    B = X.shape[0]

    param_bytes = sum(int(a.size) * a.dtype.itemsize for a in weights)
    budget = _vmem_budget_bytes()
    tb, need = _select_batch_tile(B, batch_tile, n_in_p, n_hid_p, z_pad,
                                  param_bytes, budget)
    b_pad = tb * pl.cdiv(B, tb)
    grid = (b_pad // tb,)

    # NOTE: input kept bf16 for MXU throughput; within documented tolerance.
    x_p = _pad2d(X.astype(jnp.float32), b_pad, n_in_p).astype(jnp.bfloat16)
    eps_p = _pad2d(eps.astype(jnp.float32), b_pad, z_pad)

    def row_spec(shape):
        return pl.BlockSpec(shape, lambda i: (i, 0))

    def resident_spec(a):
        # Constant index_map -> block never changes; single buffer suffices.
        return pl.BlockSpec(a.shape, lambda i: (0, 0),
                            pipeline_mode=pl.Buffered(1))

    in_specs = [row_spec((tb, n_in_p)), row_spec((tb, z_pad))]
    in_specs += [resident_spec(w) for w in weights]
    out_specs = (row_spec((tb, n_in_p)), row_spec((tb, 3 * z_pad)))
    out_shape = (
        jax.ShapeDtypeStruct((b_pad, n_in_p), out_dtype),
        jax.ShapeDtypeStruct((b_pad, 3 * z_pad), jnp.float32),
    )

    # Request only what we need (plus margin), never more than the budget.
    vmem_limit = int(min(budget, max(need + (4 << 20), 32 << 20)))

    xo_p, lat_p = pl.pallas_call(
        functools.partial(vae_kernel, z_pad=z_pad),
        out_shape=out_shape,
        grid=grid,
        in_specs=in_specs,
        out_specs=out_specs,
        compiler_params=pltpu.CompilerParams(
            dimension_semantics=("parallel",),
            vmem_limit_bytes=vmem_limit,
        ),
    )(x_p, eps_p, *weights)

    xo = xo_p[:B, :n_in]
    mu = lat_p[:B, :z_dim]
    lv = lat_p[:B, z_pad:z_pad + z_dim]
    z = lat_p[:B, 2 * z_pad:2 * z_pad + z_dim]
    return dict(x=xo, latent=dict(mu=mu, logvar=lv, z=z))


# --------------------------------------------------------------------------
# Pure-JAX fp32 reference (matches PyTorch eval-mode forward)
# --------------------------------------------------------------------------
def vae_reference(x, eps, params):
    X = x[:, 0, :] if (x.ndim == 3 and x.shape[1] == 1) else x
    h = X @ params["We"] + params["be"]
    h = (h - params["me"]) * jax.lax.rsqrt(params["ve"] + BN_EPS) * params["ge"] + params["bte"]
    h = jnp.maximum(h, 0.0)
    mu = h @ params["Wmu"] + params["bmu"]
    lv = h @ params["Wlv"] + params["blv"]
    z = mu + jnp.exp(0.5 * lv) * eps
    d = z @ params["Wd"] + params["bd"]
    d = (d - params["md"]) * jax.lax.rsqrt(params["vd"] + BN_EPS) * params["gd"] + params["btd"]
    d = jnp.maximum(d, 0.0)
    xo = jnp.maximum(d @ params["Wf"] + params["bf"], 0.0)
    return dict(x=xo, latent=dict(mu=mu, logvar=lv, z=z))


def init_params(key, n_in, n_hidden, z_dim):
    """Deterministic synthetic init. Linear weights stored as (in, out)."""
    keys = jax.random.split(key, 9)

    def lin(k, fan_in, fan_out):
        lim = 1.0 / jnp.sqrt(jnp.float32(fan_in))
        kw, kb = jax.random.split(k)
        W = jax.random.uniform(kw, (fan_in, fan_out), jnp.float32, -lim, lim)
        b = jax.random.uniform(kb, (1, fan_out), jnp.float32, -lim, lim)
        return W, b

    We, be = lin(keys[0], n_in, n_hidden)
    Wmu, bmu = lin(keys[1], n_hidden, z_dim)
    Wlv, blv = lin(keys[2], n_hidden, z_dim)
    Wd, bd = lin(keys[3], z_dim, n_hidden)
    Wf, bf = lin(keys[4], n_hidden, n_in)

    def bn(k):
        k1, k2, k3, k4 = jax.random.split(k, 4)
        g = 1.0 + 0.1 * jax.random.normal(k1, (1, n_hidden), jnp.float32)
        bt = 0.1 * jax.random.normal(k2, (1, n_hidden), jnp.float32)
        m = 0.1 * jax.random.normal(k3, (1, n_hidden), jnp.float32)
        v = 1.0 + 0.1 * jax.random.uniform(k4, (1, n_hidden), jnp.float32)
        return g, bt, m, v

    ge, bte, me, ve = bn(keys[5])
    gd, btd, md, vd = bn(keys[6])

    return dict(
        We=We, be=be, ge=ge, bte=bte, me=me, ve=ve,
        Wmu=Wmu, bmu=bmu, Wlv=Wlv, blv=blv,
        Wd=Wd, bd=bd, gd=gd, btd=btd, md=md, vd=vd,
        Wf=Wf, bf=bf,
    )


if __name__ == "__main__":
    # Small shapes consistent with the module: n_vars=32, n_hidden=64, z_dim=16.
    B, n_in, n_hidden, z_dim = 8, 32, 64, 16

    key = jax.random.PRNGKey(0)
    k_x, k_eps, k_params = jax.random.split(key, 3)

    x = jax.random.uniform(k_x, (B, 1, n_in), jnp.float32)   # counts-like input
    eps = jax.random.normal(k_eps, (B, z_dim), jnp.float32)  # reparameterization noise
    params = init_params(k_params, n_in, n_hidden, z_dim)

    prepared = prepare_params(params)   # one-time weight packing (cacheable)
    out = vae_forward(x, eps, prepared)
    jax.block_until_ready(out)

    assert out["x"].shape == (B, n_in)
    assert out["latent"]["mu"].shape == (B, z_dim)
    assert out["latent"]["logvar"].shape == (B, z_dim)
    assert out["latent"]["z"].shape == (B, z_dim)
    assert not bool(jnp.isnan(out["x"].astype(jnp.float32)).any())

    # Correctness vs fp32 reference (kernel uses bf16 matmuls / bf16 output).
    ref = vae_reference(x, eps, params)
    xo_f32 = out["x"].astype(jnp.float32)
    assert bool(jnp.allclose(xo_f32, ref["x"], atol=1e-1, rtol=1e-1))
    assert bool(jnp.allclose(out["latent"]["mu"], ref["latent"]["mu"], atol=1e-1, rtol=1e-1))
    assert bool(jnp.allclose(out["latent"]["logvar"], ref["latent"]["logvar"], atol=1e-1, rtol=1e-1))
    assert bool(jnp.allclose(out["latent"]["z"], ref["latent"]["z"], atol=1e-1, rtol=1e-1))

    print("KERNEL_OK")
</pallas_src>

<mosaic_0001>
module attributes {stable_mosaic.version = 11 : i64} {
  func.func @vae_kernel(%arg0: i32, %arg1: memref<16x128xbf16, #tpu.memory_space<vmem>>, %arg2: memref<16x128xf32, #tpu.memory_space<vmem>>, %arg3: memref<128x128xbf16, #tpu.memory_space<vmem>>, %arg4: memref<1x128xf32, #tpu.memory_space<vmem>>, %arg5: memref<128x256xbf16, #tpu.memory_space<vmem>>, %arg6: memref<1x256xf32, #tpu.memory_space<vmem>>, %arg7: memref<128x128xbf16, #tpu.memory_space<vmem>>, %arg8: memref<1x128xf32, #tpu.memory_space<vmem>>, %arg9: memref<128x128xbf16, #tpu.memory_space<vmem>>, %arg10: memref<1x128xf32, #tpu.memory_space<vmem>>, %arg11: memref<16x128xbf16, #tpu.memory_space<vmem>>, %arg12: memref<16x384xf32, #tpu.memory_space<vmem>>) attributes {dimension_semantics = [#tpu.dimension_semantics<parallel>], iteration_bounds = array<i64: 1>, scalar_prefetch = 0 : i64, scratch_operands = 0 : i64, tpu.core_type = #tpu.core_type<tc>, window_params = [{transform_indices = @transform_0, window_bounds = array<i64: 16, 128>}, {transform_indices = @transform_1, window_bounds = array<i64: 16, 128>}, {pipeline_mode = #tpu.pipeline_mode<synchronous>, transform_indices = @transform_2, window_bounds = array<i64: 128, 128>}, {pipeline_mode = #tpu.pipeline_mode<synchronous>, transform_indices = @transform_3, window_bounds = array<i64: 1, 128>}, {pipeline_mode = #tpu.pipeline_mode<synchronous>, transform_indices = @transform_4, window_bounds = array<i64: 128, 256>}, {pipeline_mode = #tpu.pipeline_mode<synchronous>, transform_indices = @transform_5, window_bounds = array<i64: 1, 256>}, {pipeline_mode = #tpu.pipeline_mode<synchronous>, transform_indices = @transform_6, window_bounds = array<i64: 128, 128>}, {pipeline_mode = #tpu.pipeline_mode<synchronous>, transform_indices = @transform_7, window_bounds = array<i64: 1, 128>}, {pipeline_mode = #tpu.pipeline_mode<synchronous>, transform_indices = @transform_8, window_bounds = array<i64: 128, 128>}, {pipeline_mode = #tpu.pipeline_mode<synchronous>, transform_indices = @transform_9, window_bounds = array<i64: 1, 128>}, {transform_indices = @transform_10, window_bounds = array<i64: 16, 128>}, {transform_indices = @transform_11, window_bounds = array<i64: 16, 384>}]} {
    %c0 = arith.constant 0 : index
    %c0_0 = arith.constant 0 : index
    %0 = vector.load %arg1[%c0, %c0_0] : memref<16x128xbf16, #tpu.memory_space<vmem>>, vector<16x128xbf16>
    %c0_1 = arith.constant 0 : index
    %c0_2 = arith.constant 0 : index
    %1 = vector.load %arg3[%c0_1, %c0_2] : memref<128x128xbf16, #tpu.memory_space<vmem>>, vector<128x128xbf16>
    %cst = arith.constant dense<0.000000e+00> : vector<16x128xf32>
    %2 = tpu.matmul %0, %1, %cst {dimension_numbers = #tpu.dot_dimension_numbers<[1], [0], [0], [1], [0, 0, 1, 1], [], []>} : vector<16x128xbf16>, vector<128x128xbf16>, vector<16x128xf32> -> vector<16x128xf32>
    %c0_3 = arith.constant 0 : index
    %c0_4 = arith.constant 0 : index
    %3 = vector.load %arg4[%c0_3, %c0_4] : memref<1x128xf32, #tpu.memory_space<vmem>>, vector<1x128xf32>
    %4 = vector.broadcast %3 : vector<1x128xf32> to vector<16x128xf32>
    %5 = arith.addf %2, %4 : vector<16x128xf32>
    %cst_5 = arith.constant 0.000000e+00 : f32
    %6 = vector.broadcast %cst_5 : f32 to vector<16x128xf32>
    %7 = arith.maximumf %5, %6 : vector<16x128xf32>
    %8 = arith.truncf %7 : vector<16x128xf32> to vector<16x128xbf16>
    %c0_6 = arith.constant 0 : index
    %c0_7 = arith.constant 0 : index
    %9 = vector.load %arg5[%c0_6, %c0_7] : memref<128x256xbf16, #tpu.memory_space<vmem>>, vector<128x256xbf16>
    %cst_8 = arith.constant dense<0.000000e+00> : vector<16x256xf32>
    %10 = tpu.matmul %8, %9, %cst_8 {dimension_numbers = #tpu.dot_dimension_numbers<[1], [0], [0], [1], [0, 0, 1, 1], [], []>} : vector<16x128xbf16>, vector<128x256xbf16>, vector<16x256xf32> -> vector<16x256xf32>
    %c0_9 = arith.constant 0 : index
    %c0_10 = arith.constant 0 : index
    %11 = vector.load %arg6[%c0_9, %c0_10] : memref<1x256xf32, #tpu.memory_space<vmem>>, vector<1x256xf32>
    %12 = vector.broadcast %11 : vector<1x256xf32> to vector<16x256xf32>
    %13 = arith.addf %10, %12 : vector<16x256xf32>
    %c0_11 = arith.constant 0 : index
    %c0_12 = arith.constant 0 : index
    %14 = vector.load %arg12[%c0_11, %c0_12] : memref<16x384xf32, #tpu.memory_space<vmem>>, vector<16x256xf32>
    tpu.vector_store %arg12[%c0_11, %c0_12], %13 {strides = array<i32>} : memref<16x384xf32, #tpu.memory_space<vmem>>, vector<16x256xf32>,
    %15 = vector.extract_strided_slice %13 {offsets = [0, 0], sizes = [16, 128], strides = [1, 1]} : vector<16x256xf32> to vector<16x128xf32>
    %16 = vector.extract_strided_slice %13 {offsets = [0, 128], sizes = [16, 128], strides = [1, 1]} : vector<16x256xf32> to vector<16x128xf32>
    %cst_13 = arith.constant 5.000000e-01 : f32
    %17 = vector.broadcast %cst_13 : f32 to vector<16x128xf32>
    %18 = arith.mulf %17, %16 : vector<16x128xf32>
    %19 = math.exp %18 : vector<16x128xf32>
    %c0_14 = arith.constant 0 : index
    %c0_15 = arith.constant 0 : index
    %20 = vector.load %arg2[%c0_14, %c0_15] : memref<16x128xf32, #tpu.memory_space<vmem>>, vector<16x128xf32>
    %21 = arith.mulf %19, %20 : vector<16x128xf32>
    %22 = arith.addf %15, %21 : vector<16x128xf32>
    %c0_16 = arith.constant 0 : index
    %c256 = arith.constant 256 : index
    %23 = vector.load %arg12[%c0_16, %c256] : memref<16x384xf32, #tpu.memory_space<vmem>>, vector<16x128xf32>
    tpu.vector_store %arg12[%c0_16, %c256], %22 {strides = array<i32>} : memref<16x384xf32, #tpu.memory_space<vmem>>, vector<16x128xf32>,
    %24 = arith.truncf %22 : vector<16x128xf32> to vector<16x128xbf16>
    %c0_17 = arith.constant 0 : index
    %c0_18 = arith.constant 0 : index
    %25 = vector.load %arg7[%c0_17, %c0_18] : memref<128x128xbf16, #tpu.memory_space<vmem>>, vector<128x128xbf16>
    %cst_19 = arith.constant dense<0.000000e+00> : vector<16x128xf32>
    %26 = tpu.matmul %24, %25, %cst_19 {dimension_numbers = #tpu.dot_dimension_numbers<[1], [0], [0], [1], [0, 0, 1, 1], [], []>} : vector<16x128xbf16>, vector<128x128xbf16>, vector<16x128xf32> -> vector<16x128xf32>
    %c0_20 = arith.constant 0 : index
    %c0_21 = arith.constant 0 : index
    %27 = vector.load %arg8[%c0_20, %c0_21] : memref<1x128xf32, #tpu.memory_space<vmem>>, vector<1x128xf32>
    %28 = vector.broadcast %27 : vector<1x128xf32> to vector<16x128xf32>
    %29 = arith.addf %26, %28 : vector<16x128xf32>
    %cst_22 = arith.constant 0.000000e+00 : f32
    %30 = vector.broadcast %cst_22 : f32 to vector<16x128xf32>
    %31 = arith.maximumf %29, %30 : vector<16x128xf32>
    %32 = arith.truncf %31 : vector<16x128xf32> to vector<16x128xbf16>
    %c0_23 = arith.constant 0 : index
    %c0_24 = arith.constant 0 : index
    %33 = vector.load %arg9[%c0_23, %c0_24] : memref<128x128xbf16, #tpu.memory_space<vmem>>, vector<128x128xbf16>
    %cst_25 = arith.constant dense<0.000000e+00> : vector<16x128xf32>
    %34 = tpu.matmul %32, %33, %cst_25 {dimension_numbers = #tpu.dot_dimension_numbers<[1], [0], [0], [1], [0, 0, 1, 1], [], []>} : vector<16x128xbf16>, vector<128x128xbf16>, vector<16x128xf32> -> vector<16x128xf32>
    %c0_26 = arith.constant 0 : index
    %c0_27 = arith.constant 0 : index
    %35 = vector.load %arg10[%c0_26, %c0_27] : memref<1x128xf32, #tpu.memory_space<vmem>>, vector<1x128xf32>
    %36 = vector.broadcast %35 : vector<1x128xf32> to vector<16x128xf32>
    %37 = arith.addf %34, %36 : vector<16x128xf32>
    %cst_28 = arith.constant 0.000000e+00 : f32
    %38 = vector.broadcast %cst_28 : f32 to vector<16x128xf32>
    %39 = arith.maximumf %37, %38 : vector<16x128xf32>
    %40 = arith.truncf %39 : vector<16x128xf32> to vector<16x128xbf16>
    %c0_29 = arith.constant 0 : index
    %c0_30 = arith.constant 0 : index
    %41 = vector.load %arg11[%c0_29, %c0_30] : memref<16x128xbf16, #tpu.memory_space<vmem>>, vector<16x128xbf16>
    tpu.vector_store %arg11[%c0_29, %c0_30], %40 {strides = array<i32>} : memref<16x128xbf16, #tpu.memory_space<vmem>>, vector<16x128xbf16>,
    return
  }
  func.func @transform_0(%arg0: i32) -> (i32, i32) {
    %c0_i32 = arith.constant 0 : i32
    %c0_i32_0 = arith.constant 0 : i32
    return %arg0, %c0_i32 : i32, i32
  }
  func.func @transform_1(%arg0: i32) -> (i32, i32) {
    %c0_i32 = arith.constant 0 : i32
    %c0_i32_0 = arith.constant 0 : i32
    return %arg0, %c0_i32 : i32, i32
  }
  func.func @transform_2(%arg0: i32) -> (i32, i32) {
    %c0_i32 = arith.constant 0 : i32
    %c0_i32_0 = arith.constant 0 : i32
    %c0_i32_1 = arith.constant 0 : i32
    return %c0_i32, %c0_i32_0 : i32, i32
  }
  func.func @transform_3(%arg0: i32) -> (i32, i32) {
    %c0_i32 = arith.constant 0 : i32
    %c0_i32_0 = arith.constant 0 : i32
    %c0_i32_1 = arith.constant 0 : i32
    return %c0_i32, %c0_i32_0 : i32, i32
  }
  func.func @transform_4(%arg0: i32) -> (i32, i32) {
    %c0_i32 = arith.constant 0 : i32
    %c0_i32_0 = arith.constant 0 : i32
    %c0_i32_1 = arith.constant 0 : i32
    return %c0_i32, %c0_i32_0 : i32, i32
  }
  func.func @transform_5(%arg0: i32) -> (i32, i32) {
    %c0_i32 = arith.constant 0 : i32
    %c0_i32_0 = arith.constant 0 : i32
    %c0_i32_1 = arith.constant 0 : i32
    return %c0_i32, %c0_i32_0 : i32, i32
  }
  func.func @transform_6(%arg0: i32) -> (i32, i32) {
    %c0_i32 = arith.constant 0 : i32
    %c0_i32_0 = arith.constant 0 : i32
    %c0_i32_1 = arith.constant 0 : i32
    return %c0_i32, %c0_i32_0 : i32, i32
  }
  func.func @transform_7(%arg0: i32) -> (i32, i32) {
    %c0_i32 = arith.constant 0 : i32
    %c0_i32_0 = arith.constant 0 : i32
    %c0_i32_1 = arith.constant 0 : i32
    return %c0_i32, %c0_i32_0 : i32, i32
  }
  func.func @transform_8(%arg0: i32) -> (i32, i32) {
    %c0_i32 = arith.constant 0 : i32
    %c0_i32_0 = arith.constant 0 : i32
    %c0_i32_1 = arith.constant 0 : i32
    return %c0_i32, %c0_i32_0 : i32, i32
  }
  func.func @transform_9(%arg0: i32) -> (i32, i32) {
    %c0_i32 = arith.constant 0 : i32
    %c0_i32_0 = arith.constant 0 : i32
    %c0_i32_1 = arith.constant 0 : i32
    return %c0_i32, %c0_i32_0 : i32, i32
  }
  func.func @transform_10(%arg0: i32) -> (i32, i32) {
    %c0_i32 = arith.constant 0 : i32
    %c0_i32_0 = arith.constant 0 : i32
    return %arg0, %c0_i32 : i32, i32
  }
  func.func @transform_11(%arg0: i32) -> (i32, i32) {
    %c0_i32 = arith.constant 0 : i32
    %c0_i32_0 = arith.constant 0 : i32
    return %arg0, %c0_i32 : i32, i32
  }
}

</mosaic_0001>

<bundles_post_ra>
// kernel: tpu_custom_call.1
= control target key start
LH: loop header
LB: loop body
LE: loop exit
PB: predicated region body
PF: predicated region fallthrough
CT: control target
= control target key end

     0   :  { %17 = vsyncpa [#allocation3], 0  ;;  %s1318_s0 = inlined_call_operand.hbm [shape: bf16[16,128], index: 0, kind: input, shape index: {}]   ;;  %s1319_s1 = inlined_call_operand.hbm [shape: f32[16,128], index: 1, kind: input, shape index: {}]   ;;  %s1320_s2 = inlined_call_operand.hbm [shape: bf16[128,128], index: 2, kind: input, shape index: {}]   ;;  %s1321_s3 = inlined_call_operand.vmem [shape: f32[1,128], index: 3, kind: input, shape index: {}]   ;;  %s1322_s4 = inlined_call_operand.hbm [shape: bf16[128,256], index: 4, kind: input, shape index: {}]   ;;  %s1323_s5 = inlined_call_operand.vmem [shape: f32[1,256], index: 5, kind: input, shape index: {}]   ;;  %s1324_s6 = inlined_call_operand.hbm [shape: bf16[128,128], index: 6, kind: input, shape index: {}]   ;;  %s1325_s7 = inlined_call_operand.vmem [shape: f32[1,128], index: 7, kind: input, shape index: {}]   ;;  %s1326_s8 = inlined_call_operand.hbm [shape: bf16[128,128], index: 8, kind: input, shape index: {}]   ;;  %s1327_s9 = inlined_call_operand.vmem [shape: f32[1,128], index: 9, kind: input, shape index: {}]   ;;  %s1328_s10 = inlined_call_operand.hbm [shape: bf16[16,128], index: 10, kind: output, shape index: {0}]   ;;  %s1329_s11 = inlined_call_operand.hbm [shape: f32[16,384], index: 11, kind: output, shape index: {1}]  }
   0x1   :  { %18 = vsyncpa [#allocation6], 0 }
   0x2   :  { %19 = vsyncpa [#allocation9], 0 }
   0x3   :  { %20 = vsyncpa [#allocation12], 0 }
   0x4   :  { %21 = vsyncpa [#allocation4], 0 }
   0x5   :  { %22 = vsyncpa [#allocation15], 0  ;;  %s1088_s17 = smov [#allocation5]   ;;  %s900_s21 = scalar_lea.hbm %s1319_s1, 256 }
   0x6   :  { %s40_s18 = sshll.u32 %s1088_s17, 4  ;;  %p901_p0 = scmp.ne.s32.totalorder %s1319_s1, %s900_s21  ;;  %s41_s18 = int_to_ptr.vmem [resolvable:$true] %s40_s18 }
   0x7   :  { %p904_p1 = scmp.lt.u32.totalorder %s900_s21, %s1319_s1 }
   0x9   :  { %p906_p2 = pnand %p904_p1, %p901_p0 }
   0xb   :  { %909 = shalt.err (!%p906_p2)
}
   0xc   :  { %s910_s26 = scalar_lea.vmem %s41_s18, 256  ;;  %p915_p4 = scmp.lt.s32.totalorder %s41_s18, %s41_s18 }
   0xd   :  { %p911_p3 = scmp.ne.s32.totalorder %s41_s18, %s910_s26  ;;  %p916_p5 = scmp.lt.s32.totalorder %s910_s26, %s910_s26 }
   0xf   :  { %p917_p6 = por %p916_p5, %p915_p4 }
  0x11   :  { %p918_p7 = pnand %p917_p6, %p911_p3 }
  0x13   :  { %921 = shalt.err (!%p918_p7)
}
  0x14   :  { %s1089_s27 = smov 128   ;;  %s1090_s28 = smov 8  }
  0x15   :  { %46 = dma.hbm_to_vmem [thread:$0]  %s1319_s1, 256, %s41_s18, [#allocation6], %s1089_s27, %s1089_s27, %s1090_s28  }
  0x16   :  { %s1091_s12 = smov [#allocation8]   ;;  %s1092_s14 = smov [#allocation2]  }
  0x17   :  { %s66_s13 = sshll.u32 %s1091_s12, 4  ;;  %s28_s15 = sshll.u32 %s1092_s14, 4  ;;  %s67_s13 = int_to_ptr.vmem [resolvable:$true] %s66_s13  ;;  %s29_s15 = int_to_ptr.vmem [resolvable:$true] %s28_s15 }
  0x18   :  { %s922_s19 = scalar_lea.hbm %s1322_s4, 2048 }
  0x19   :  { %p923_p8 = scmp.ne.s32.totalorder %s1322_s4, %s922_s19  ;;  %p926_p9 = scmp.lt.u32.totalorder %s922_s19, %s1322_s4 }
  0x1b   :  { %p928_p10 = pnand %p926_p9, %p923_p8 }
  0x1d   :  { %931 = shalt.err (!%p928_p10)
}
  0x1e   :  { %s932_s1 = scalar_lea.vmem %s67_s13, 2048  ;;  %p937_p12 = scmp.lt.s32.totalorder %s67_s13, %s67_s13 }
  0x1f   :  { %p933_p11 = scmp.ne.s32.totalorder %s67_s13, %s932_s1  ;;  %p938_p13 = scmp.lt.s32.totalorder %s932_s1, %s932_s1 }
  0x21   :  { %p939_p0 = por %p938_p13, %p937_p12 }
  0x23   :  { %p940_p1 = pnand %p939_p0, %p933_p11 }
  0x25   :  { %943 = shalt.err (!%p940_p1)
}
  0x26   :  { %72 = dma.hbm_to_vmem [thread:$0]  %s1322_s4, 2048, %s67_s13, [#allocation9], %s1089_s27, %s1089_s27, %s1090_s28  }
  0x27   :  { %s944_s29 = scalar_lea.hbm %s1318_s0, 128 }
  0x28   :  { %p945_p2 = scmp.ne.s32.totalorder %s1318_s0, %s944_s29  ;;  %p948_p3 = scmp.lt.u32.totalorder %s944_s29, %s1318_s0 }
  0x2a   :  { %p950_p4 = pnand %p948_p3, %p945_p2 }
  0x2c   :  { %953 = shalt.err (!%p950_p4)
}
  0x2d   :  { %s954_s17 = scalar_lea.vmem %s29_s15, 128  ;;  %p959_p6 = scmp.lt.s32.totalorder %s29_s15, %s29_s15 }
  0x2e   :  { %p955_p5 = scmp.ne.s32.totalorder %s29_s15, %s954_s17  ;;  %p960_p7 = scmp.lt.s32.totalorder %s954_s17, %s954_s17 }
  0x30   :  { %p961_p8 = por %p960_p7, %p959_p6 }
  0x32   :  { %p962_p9 = pnand %p961_p8, %p955_p5 }
  0x34   :  { %965 = shalt.err (!%p962_p9)
}
  0x35   :  { %s1093_s4 = smov 64   ;;  %s1094_s27 = smov 4  }
  0x36   :  { %34 = dma.hbm_to_vmem [thread:$0]  %s1318_s0, 128, %s29_s15, [#allocation3], %s1093_s4, %s1093_s4, %s1094_s27  }
  0x37   :  { %s1095_s19 = smov [#allocation7]   ;;  %s1096_s21 = smov [#allocation10]  }
  0x38   :  { %s52_s20 = sshll.u32 %s1095_s19, 4  ;;  %s80_s22 = sshll.u32 %s1096_s21, 4  ;;  %s53_s20 = int_to_ptr.vmem [resolvable:$true] %s52_s20  ;;  %s81_s22 = int_to_ptr.vmem [resolvable:$true] %s80_s22 }
  0x39   :  { %s966_s18 = scalar_lea.hbm %s1320_s2, 1024 }
  0x3a   :  { %p967_p10 = scmp.ne.s32.totalorder %s1320_s2, %s966_s18  ;;  %p970_p11 = scmp.lt.u32.totalorder %s966_s18, %s1320_s2 }
  0x3c   :  { %p972_p12 = pnand %p970_p11, %p967_p10 }
  0x3e   :  { %975 = shalt.err (!%p972_p12)
}
  0x3f   :  { %s976_s0 = scalar_lea.vmem %s53_s20, 1024  ;;  %p981_p0 = scmp.lt.s32.totalorder %s53_s20, %s53_s20 }
  0x40   :  { %p977_p13 = scmp.ne.s32.totalorder %s53_s20, %s976_s0  ;;  %p982_p1 = scmp.lt.s32.totalorder %s976_s0, %s976_s0 }
  0x42   :  { %p983_p2 = por %p982_p1, %p981_p0 }
  0x44   :  { %p984_p3 = pnand %p983_p2, %p977_p13 }
  0x46   :  { %987 = shalt.err (!%p984_p3)
}
  0x47   :  { %58 = dma.hbm_to_vmem [thread:$0]  %s1320_s2, 1024, %s53_s20, [#allocation6], %s1093_s4, %s1093_s4, %s1094_s27  }
  0x48   :  { %s988_s16 = scalar_lea.hbm %s1324_s6, 1024 }
  0x49   :  { %p989_p4 = scmp.ne.s32.totalorder %s1324_s6, %s988_s16  ;;  %p992_p5 = scmp.lt.u32.totalorder %s988_s16, %s1324_s6 }
  0x4b   :  { %p994_p6 = pnand %p992_p5, %p989_p4 }
  0x4d   :  { %997 = shalt.err (!%p994_p6)
}
  0x4e   :  { %s998_s21 = scalar_lea.vmem %s81_s22, 1024  ;;  %p1003_p8 = scmp.lt.s32.totalorder %s81_s22, %s81_s22 }
  0x4f   :  { %p999_p7 = scmp.ne.s32.totalorder %s81_s22, %s998_s21  ;;  %p1004_p9 = scmp.lt.s32.totalorder %s998_s21, %s998_s21 }
  0x51   :  { %p1005_p10 = por %p1004_p9, %p1003_p8 }
  0x53   :  { %p1006_p11 = pnand %p1005_p10, %p999_p7 }
  0x55   :  { %1009 = shalt.err (!%p1006_p11)
}
  0x56   :  { %86 = dma.hbm_to_vmem [thread:$0]  %s1324_s6, 1024, %s81_s22, [#allocation9], %s1093_s4, %s1093_s4, %s1094_s27  }
  0x57   :  { %s1097_s23 = smov [#allocation11]   ;;  %s1010_s25 = scalar_lea.hbm %s1326_s8, 1024 }
  0x58   :  { %s94_s1 = sshll.u32 %s1097_s23, 4  ;;  %p1011_p12 = scmp.ne.s32.totalorder %s1326_s8, %s1010_s25  ;;  %s95_s1 = int_to_ptr.vmem [resolvable:$true] %s94_s1 }
  0x59   :  { %p1014_p13 = scmp.lt.u32.totalorder %s1010_s25, %s1326_s8 }
  0x5b   :  { %p1016_p0 = pnand %p1014_p13, %p1011_p12 }
  0x5d   :  { %1019 = shalt.err (!%p1016_p0)
}
  0x5e   :  { %s1020_s30 = scalar_lea.vmem %s95_s1, 1024  ;;  %p1025_p2 = scmp.lt.s32.totalorder %s95_s1, %s95_s1 }
  0x5f   :  { %p1021_p1 = scmp.ne.s32.totalorder %s95_s1, %s1020_s30  ;;  %p1026_p3 = scmp.lt.s32.totalorder %s1020_s30, %s1020_s30 }
  0x61   :  { %p1027_p4 = por %p1026_p3, %p1025_p2 }
  0x63   :  { %p1028_p5 = pnand %p1027_p4, %p1021_p1 }
  0x65   :  { %1031 = shalt.err (!%p1028_p5)
}
  0x66   :  { %100 = dma.hbm_to_vmem [thread:$0]  %s1326_s8, 1024, %s95_s1, [#allocation12], %s1093_s4, %s1093_s4, %s1094_s27  }
  0x67   :  { %1076 = dma.done.wait [#allocation3], 128  }
  0x68   :  { %1077 = vsyncadd [#allocation3], 4294967168 }
  0x69   :  { %1078 = dma.done.wait [#allocation6], 1280  }
  0x6a   :  { %1079 = vsyncadd [#allocation6], 4294966016 }
  0x6b   :  { %1080 = dma.done.wait [#allocation9], 3072  }
  0x6c   :  { %1081 = vsyncadd [#allocation9], 4294964224 }
  0x6d   :  { %1082 = dma.done.wait [#allocation12], 1024  }
  0x6e   :  { %1083 = vsyncadd [#allocation12], 4294966272  ;;  %v1098_v0 = vmov 0.0   ;;  %vm1099_vm0 = vmmov 0   ;;  %v847_v1 = vld [vmem:[#allocation7] sm:$0xff]   ;;  %v848_v2 = vld [vmem:[#allocation7 + $0x8] sm:$0xff]   ;;  %v263_v51 = vlaneseq }
  0x6f   :  { %770 = vmatprep.subr.bf16.mxu0 %v1098_v0  ;;  %786 = vmatprep.mubr.msk.bf16.mxu0 %vm1099_vm0, %v1098_v0  ;;  %v849_v3 = vld [vmem:[#allocation7 + $0x10] sm:$0xff]   ;;  %v850_v4 = vld [vmem:[#allocation7 + $0x18] sm:$0xff]   ;;  %v856_v5 = vld [vmem:[#allocation8 + $0x4] ss:$8 sps:$4 sm:$0xff]   ;;  %v1100_v26 = vmov 0   ;;  %s1101_s17 = smov [#allocation14]  }
  0x70   :  { %771 = vmatpush3.bf16.msra.mxu0 %v847_v1  ;;  %v858_v6 = vld [vmem:[#allocation8] ss:$8 sps:$4 sm:$0xff]   ;;  %353 = vmatprep.subr.bf16.mxu1 %v856_v5  ;;  %v859_v7 = vld [vmem:[#allocation8 + $0x14] ss:$8 sps:$4 sm:$0xff]   ;;  %v861_v8 = vld [vmem:[#allocation8 + $0x10] ss:$8 sps:$4 sm:$0xff]  }
  0x71   :  { %772 = vmatprep.subr.bf16.mxu0 %v1098_v0  ;;  %354 = vmatpush1.bf16.msra.mxu1 %v858_v6  ;;  %v862_v9 = vld [vmem:[#allocation8 + $0x24] ss:$8 sps:$4 sm:$0xff]   ;;  %v864_v12 = vld [vmem:[#allocation8 + $0x20] ss:$8 sps:$4 sm:$0xff]   ;;  %v865_v13 = vld [vmem:[#allocation8 + $0x34] ss:$8 sps:$4 sm:$0xff]  }
  0x72   :  { %355 = vmatprep.subr.bf16.mxu1 %v859_v7  ;;  %v851_v10 = vld [vmem:[#allocation7 + $0x20] sm:$0xff]   ;;  %v852_v11 = vld [vmem:[#allocation7 + $0x28] sm:$0xff]   ;;  %v867_v14 = vld [vmem:[#allocation8 + $0x30] ss:$8 sps:$4 sm:$0xff]   ;;  %385 = vmatprep.mubr.bf16.mxu1 %v1100_v26  ;;  %v264_v52 = vshrl.u32 %v263_v51, 7  ;;  %s671_s28 = sshll.u32 %s1101_s17, 4  ;;  %s672_s28 = int_to_ptr.vmem [resolvable:$true] %s671_s28 }
  0x73   :  { %v868_v15 = vld [vmem:[#allocation8 + $0x44] ss:$8 sps:$4 sm:$0xff]   ;;  %v853_v16 = vld [vmem:[#allocation7 + $0x30] sm:$0xff]   ;;  %v870_v17 = vld [vmem:[#allocation8 + $0x40] ss:$8 sps:$4 sm:$0xff]   ;;  %s1032_s13 = scalar_lea.vmem %s672_s28, 768  ;;  %p1037_p7 = scmp.lt.s32.totalorder %s672_s28, %s672_s28 }
  0x74   :  { %773 = vmatpush3.bf16.msra.mxu0 %v848_v2  ;;  %v871_v18 = vld [vmem:[#allocation8 + $0x54] ss:$8 sps:$4 sm:$0xff]   ;;  %v873_v20 = vld [vmem:[#allocation8 + $0x50] ss:$8 sps:$4 sm:$0xff]   ;;  %v855_v21 = vld [vmem:[#allocation2] sm:$0xff]   ;;  %v265_v53 = vsub.s32 0, %v264_v52  ;;  %p1033_p6 = scmp.ne.s32.totalorder %s672_s28, %s1032_s13  ;;  %p1038_p8 = scmp.lt.s32.totalorder %s1032_s13, %s1032_s13 }
  0x75   :  { %774 = vmatprep.subr.bf16.mxu0 %v1098_v0  ;;  %356 = vmatpush1.bf16.msra.mxu1 %v861_v8  ;;  %v854_v19 = vld [vmem:[#allocation7 + $0x38] sm:$0xff]   ;;  %v874_v22 = vld [vmem:[#allocation8 + $0x64] ss:$8 sps:$4 sm:$0xff]   ;;  %v876_v23 = vld [vmem:[#allocation8 + $0x60] ss:$8 sps:$4 sm:$0xff]   ;;  %v269_v55 = vsub.s32 1, %v264_v52 }
  0x76   :  { %357 = vmatprep.subr.bf16.mxu1 %v862_v9  ;;  %v877_v24 = vld [vmem:[#allocation8 + $0x74] ss:$8 sps:$4 sm:$0xff]   ;;  %v879_v25 = vld [vmem:[#allocation8 + $0x70] ss:$8 sps:$4 sm:$0xff]   ;;  %v880_v27 = vld [vmem:[#allocation10] sm:$0xff]   ;;  %p1039_p9 = por %p1038_p8, %p1037_p7 }
  0x77   :  { %v690_v28 = vld [vmem:[%s1321_s3] ss:$0 sm:$0xff]  ;;  %v882_v39 = vld [vmem:[#allocation10 + $0x10] sm:$0xff]   ;;  %v883_v40 = vld [vmem:[#allocation10 + $0x18] sm:$0xff]  }
  0x78   :  { %775 = vmatpush3.bf16.msra.mxu0 %v849_v3  ;;  %v881_v38 = vld [vmem:[#allocation10 + $0x8] sm:$0xff]   ;;  %v884_v41 = vld [vmem:[#allocation10 + $0x20] sm:$0xff]   ;;  %v886_v43 = vld [vmem:[#allocation10 + $0x30] sm:$0xff]   ;;  %p1040_p10 = pnand %p1039_p9, %p1033_p6 }
  0x79   :  { %776 = vmatprep.subr.bf16.mxu0 %v1098_v0  ;;  %358 = vmatpush1.bf16.msra.mxu1 %v864_v12  ;;  %v885_v42 = vld [vmem:[#allocation10 + $0x28] sm:$0xff]   ;;  %v887_v44 = vld [vmem:[#allocation10 + $0x38] sm:$0xff]   ;;  %v888_v45 = vld [vmem:[#allocation11] sm:$0xff]  }
  0x7a   :  { %359 = vmatprep.subr.bf16.mxu1 %v865_v13  ;;  %v889_v46 = vld [vmem:[#allocation11 + $0x8] sm:$0xff]   ;;  %v890_v47 = vld [vmem:[#allocation11 + $0x10] sm:$0xff]   ;;  %v891_v48 = vld [vmem:[#allocation11 + $0x18] sm:$0xff]  }
  0x7b   :  { %v892_v49 = vld [vmem:[#allocation11 + $0x20] sm:$0xff]   ;;  %v893_v50 = vld [vmem:[#allocation11 + $0x28] sm:$0xff]   ;;  %v406_v7 = vld [vmem:[#allocation5] sm:$0xff] }
  0x7c   :  { %777 = vmatpush3.bf16.msra.mxu0 %v850_v4  ;;  %v261_v54 = vld [vmem:[%s1323_s5] sm:$0x3]  ;;  %v407_v9 = vld [vmem:[#allocation5 + $0x8] sm:$0xff] }
  0x7d   :  { %778 = vmatprep.subr.bf16.mxu0 %v1098_v0  ;;  %360 = vmatpush1.bf16.msra.mxu1 %v867_v14  ;;  %v266_v56 = vrot.slane %v261_v54, %v265_v53  ;;  %v270_v57 = vrot.slane %v261_v54, %v269_v55 }
  0x7e   :  { %361 = vmatprep.subr.bf16.mxu1 %v868_v15 }
  0x80   :  { %779 = vmatpush3.bf16.msra.mxu0 %v851_v10 }
  0x81   :  { %780 = vmatprep.subr.bf16.mxu0 %v1098_v0  ;;  %362 = vmatpush1.bf16.msra.mxu1 %v870_v17  ;;  %v895_v17 = vld [vmem:[#allocation11 + $0x38] sm:$0xff]  }
  0x82   :  { %363 = vmatprep.subr.bf16.mxu1 %v871_v18  ;;  %v716_v18 = vld [vmem:[%s1325_s7] ss:$0 sm:$0xff] }
  0x84   :  { %781 = vmatpush3.bf16.msra.mxu0 %v852_v11 }
  0x85   :  { %782 = vmatprep.subr.bf16.mxu0 %v1098_v0  ;;  %364 = vmatpush1.bf16.msra.mxu1 %v873_v20 }
  0x86   :  { %365 = vmatprep.subr.bf16.mxu1 %v874_v22 }
  0x88   :  { %783 = vmatpush3.bf16.msra.mxu0 %v853_v16  ;;  %v894_v16 = vld [vmem:[#allocation11 + $0x30] sm:$0xff]  }
  0x89   :  { %784 = vmatprep.subr.bf16.mxu0 %v1098_v0  ;;  %366 = vmatpush1.bf16.msra.mxu1 %v876_v23 }
  0x8a   :  { %367 = vmatprep.subr.bf16.mxu1 %v877_v24 }
  0x8c   :  { %785 = vmatpush3.bf16.msra.mxu0 %v854_v19 }
  0x8d   :  { %790 = vmatprep.subr.bf16.mxu0 %v1098_v0  ;;  %368 = vmatpush1.bf16.msra.mxu1 %v879_v25 }
  0x8e   :  { %810 = vmatprep.subr.bf16.mxu1 %v1098_v0 }
  0x8f   :  { %787 = vmatmul.mubr.bf16.vlgmr.msra.gmra.mrb[0].mxu0 %v855_v21 }
  0x90   :  { %806 = vmatprep.mubr.msk.bf16.mxu0 %vm1099_vm0, %v1098_v0  ;;  %791 = vmatpush3.bf16.msra.mxu0 %v880_v27 }
  0x91   :  { %792 = vmatprep.subr.bf16.mxu0 %v1098_v0 }
  0x94   :  { %793 = vmatpush3.bf16.msra.mxu0 %v881_v38 }
  0x95   :  { %794 = vmatprep.subr.bf16.mxu0 %v1098_v0 }
  0x98   :  { %795 = vmatpush3.bf16.msra.mxu0 %v882_v39 }
  0x99   :  { %796 = vmatprep.subr.bf16.mxu0 %v1098_v0 }
  0x9c   :  { %797 = vmatpush3.bf16.msra.mxu0 %v883_v40 }
  0x9d   :  { %798 = vmatprep.subr.bf16.mxu0 %v1098_v0 }
  0xa0   :  { %799 = vmatpush3.bf16.msra.mxu0 %v884_v41 }
  0xa1   :  { %800 = vmatprep.subr.bf16.mxu0 %v1098_v0 }
  0xa4   :  { %801 = vmatpush3.bf16.msra.mxu0 %v885_v42 }
  0xa5   :  { %802 = vmatprep.subr.bf16.mxu0 %v1098_v0 }
  0xa8   :  { %803 = vmatpush3.bf16.msra.mxu0 %v886_v43 }
  0xa9   :  { %804 = vmatprep.subr.bf16.mxu0 %v1098_v0 }
  0xac   :  { %805 = vmatpush3.bf16.msra.mxu0 %v887_v44 }
 0x162   :  { %v235_v29 = vpop.f32.mrb[0].mxu0 }
 0x163   :  { %v236_v30 = vadd.f32 %v690_v28, %v235_v29  ;;  %v788_v31 = vpop.f32.mrb[1].mxu0 }
 0x164   :  { %v238_v32 = vpop.f32.mrb[2].mxu0 }
 0x165   :  { %v239_v33 = vadd.f32 %v690_v28, %v238_v32  ;;  %v789_v34 = vpop.f32.mrb[3].mxu0  ;;  %v242_v35 = vmax.f32 %v236_v30, 0.0 }
 0x167   :  { %v243_v36 = vmax.f32 %v239_v33, 0.0 }
 0x169   :  { %v244_v37 = vpack.c.bf16 %v243_v36, %v242_v35 }
 0x16b   :  { %386 = vmatmul.mubr.bf16.vlgmr.msra.gmra.mrb[0].mxu1 %v244_v37 }
 0x16c   :  { %826 = vmatprep.mubr.msk.bf16.mxu1 %vm1099_vm0, %v1098_v0  ;;  %811 = vmatpush3.bf16.msra.mxu1 %v888_v45 }
 0x16d   :  { %812 = vmatprep.subr.bf16.mxu1 %v1098_v0 }
 0x170   :  { %813 = vmatpush3.bf16.msra.mxu1 %v889_v46 }
 0x171   :  { %814 = vmatprep.subr.bf16.mxu1 %v1098_v0 }
 0x174   :  { %815 = vmatpush3.bf16.msra.mxu1 %v890_v47 }
 0x175   :  { %816 = vmatprep.subr.bf16.mxu1 %v1098_v0 }
 0x178   :  { %817 = vmatpush3.bf16.msra.mxu1 %v891_v48 }
 0x179   :  { %818 = vmatprep.subr.bf16.mxu1 %v1098_v0 }
 0x17c   :  { %819 = vmatpush3.bf16.msra.mxu1 %v892_v49 }
 0x17d   :  { %820 = vmatprep.subr.bf16.mxu1 %v1098_v0 }
 0x180   :  { %821 = vmatpush3.bf16.msra.mxu1 %v893_v50 }
 0x181   :  { %822 = vmatprep.subr.bf16.mxu1 %v1098_v0 }
 0x184   :  { %823 = vmatpush3.bf16.msra.mxu1 %v894_v16 }
 0x185   :  { %824 = vmatprep.subr.bf16.mxu1 %v1098_v0 }
 0x188   :  { %825 = vmatpush3.bf16.msra.mxu1 %v895_v17 }
 0x23e   :  { %v387_v58 = vpop.f32.mrb[0].mxu1 }
 0x23f   :  { %v388_v59 = vadd.f32 %v387_v58, %v266_v56  ;;  %v389_v60 = vpop.f32.mrb[1].mxu1 }
 0x240   :  { %v390_v61 = vadd.f32 %v389_v60, %v270_v57  ;;  %v391_v62 = vpop.f32.mrb[2].mxu1 }
 0x241   :  { %396 = vst [vmem:[#allocation14] sm:$0xff] %v388_v59  ;;  %v392_v63 = vadd.f32 %v391_v62, %v266_v56  ;;  %v393_v1 = vpop.f32.mrb[3].mxu1 }
 0x242   :  { %397 = vst [vmem:[#allocation14 + $0x8] sm:$0xff] %v390_v61  ;;  %v400_v2 = vmul.f32 0.5, %v390_v61  ;;  %v394_v3 = vadd.f32 %v393_v1, %v270_v57 }
 0x243   :  { %398 = vst [vmem:[#allocation14 + $0x18] sm:$0xff] %v392_v63 }
 0x244   :  { %v402_v4 = vmul.f32 1.442695, %v400_v2  ;;  %399 = vst [vmem:[#allocation14 + $0x20] sm:$0xff] %v394_v3  ;;  %v401_v5 = vmul.f32 0.5, %v394_v3 }
 0x246   :  { %896 = vpow2.f32 %v402_v4  ;;  %v404_v6 = vmul.f32 1.442695, %v401_v5 }
 0x248   :  { %898 = vpow2.f32 %v404_v6 }
 0x250   :  { %v897_v8 = vpop.eup %896 }
 0x251   :  { %v408_v10 = vmul.f32 %v897_v8, %v406_v7 }
 0x252   :  { %v899_v11 = vpop.eup %898 }
 0x253   :  { %v409_v12 = vmul.f32 %v899_v11, %v407_v9  ;;  %v410_v13 = vadd.f32 %v408_v10, %v388_v59 }
 0x255   :  { %v411_v14 = vadd.f32 %v409_v12, %v392_v63  ;;  %412 = vst [vmem:[#allocation14 + $0x10] sm:$0xff] %v410_v13 }
 0x257   :  { %413 = vst [vmem:[#allocation14 + $0x28] sm:$0xff] %v411_v14  ;;  %v414_v15 = vpack.c.bf16 %v411_v14, %v410_v13 }
 0x259   :  { %807 = vmatmul.mubr.bf16.vlgmr.msra.gmra.mrb[4].mxu0 %v414_v15 }
 0x32c   :  { %v520_v19 = vpop.f32.mrb[4].mxu0 }
 0x32d   :  { %v521_v20 = vadd.f32 %v716_v18, %v520_v19  ;;  %v808_v21 = vpop.f32.mrb[5].mxu0 }
 0x32e   :  { %v523_v22 = vpop.f32.mrb[6].mxu0 }
 0x32f   :  { %v524_v23 = vadd.f32 %v716_v18, %v523_v22  ;;  %v809_v24 = vpop.f32.mrb[7].mxu0  ;;  %v527_v25 = vmax.f32 %v521_v20, 0.0 }
 0x331   :  { %v528_v26 = vmax.f32 %v524_v23, 0.0 }
 0x333   :  { %v529_v27 = vpack.c.bf16 %v528_v26, %v527_v25 }
 0x335   :  { %827 = vmatmul.mubr.bf16.vlgmr.msra.gmra.mrb[4].mxu1 %v529_v27 }
 0x336   :  { %1043 = shalt.err (!%p1040_p10)
}
 0x337   :  { %s1044_s21 = scalar_lea.hbm %s1329_s11, 768 }
 0x338   :  { %p1045_p11 = scmp.ne.s32.totalorder %s1329_s11, %s1044_s21  ;;  %p1048_p12 = scmp.lt.u32.totalorder %s1044_s21, %s1329_s11 }
 0x33a   :  { %p1050_p13 = pnand %p1048_p12, %p1045_p11 }
 0x33c   :  { %1053 = shalt.err (!%p1050_p13)
}
 0x33d   :  { %s1102_s18 = smov 384   ;;  %s1103_s24 = smov 24   ;;  %v725_v0 = vld [vmem:[%s1327_s9] ss:$0 sm:$0xff] }
 0x33e   :  { %677 = dma.vmem_to_hbm [thread:$0]  %s672_s28, 768, %s1329_s11, [#allocation15], %s1102_s18, %s1102_s18, %s1103_s24  }
 0x33f   :  { %s1104_s15 = smov [#allocation13]  }
 0x340   :  { %s659_s30 = sshll.u32 %s1104_s15, 4  ;;  %s660_s30 = int_to_ptr.vmem [resolvable:$true] %s659_s30 }
 0x341   :  { %s1054_s6 = scalar_lea.vmem %s660_s30, 128  ;;  %p1059_p1 = scmp.lt.s32.totalorder %s660_s30, %s660_s30 }
 0x342   :  { %p1055_p0 = scmp.ne.s32.totalorder %s660_s30, %s1054_s6  ;;  %p1060_p2 = scmp.lt.s32.totalorder %s1054_s6, %s1054_s6 }
 0x344   :  { %p1061_p3 = por %p1060_p2, %p1059_p1 }
 0x346   :  { %p1062_p4 = pnand %p1061_p3, %p1055_p0 }
 0x408   :  { %v635_v28 = vpop.f32.mrb[4].mxu1 }
 0x409   :  { %v636_v29 = vadd.f32 %v725_v0, %v635_v28  ;;  %v828_v30 = vpop.f32.mrb[5].mxu1 }
 0x40a   :  { %v638_v31 = vpop.f32.mrb[6].mxu1 }
 0x40b   :  { %v639_v32 = vadd.f32 %v725_v0, %v638_v31  ;;  %v829_v33 = vpop.f32.mrb[7].mxu1  ;;  %v642_v34 = vmax.f32 %v636_v29, 0.0 }
 0x40d   :  { %v643_v35 = vmax.f32 %v639_v32, 0.0 }
 0x40f   :  { %v741_v36 = vpack.c.bf16 %v643_v35, %v642_v34 }
 0x411   :  { %742 = vst [vmem:[#allocation13] sm:$0xff] %v741_v36  }
 0x412   :  { %1065 = shalt.err (!%p1062_p4)
}
 0x413   :  { %s1066_s22 = scalar_lea.hbm %s1328_s10, 128 }
 0x414   :  { %p1067_p5 = scmp.ne.s32.totalorder %s1328_s10, %s1066_s22  ;;  %p1070_p6 = scmp.lt.u32.totalorder %s1066_s22, %s1328_s10 }
 0x416   :  { %p1072_p7 = pnand %p1070_p6, %p1067_p5 }
 0x418   :  { %1075 = shalt.err (!%p1072_p7)
}
 0x419   :  { %665 = dma.vmem_to_hbm [thread:$0]  %s660_s30, 128, %s1328_s10, [#allocation4], %s1093_s4, %s1093_s4, %s1094_s27  }
 0x41a   :  { %1084 = dma.done.wait [#allocation4], 128  }
 0x41b   :  { %1085 = vsyncadd [#allocation4], 4294967168 }
 0x41c   :  { %1086 = dma.done.wait [#allocation15], 768  }
 0x41d   :  { %1087 = vsyncadd [#allocation15], 4294966528 }
 0x41e   :  { %684 = vsyncpa [#allocation3], 1 }
 0x41f   :  { %685 = vsyncpa [#allocation6], 1 }
 0x420   :  { %686 = vsyncpa [#allocation9], 1 }
 0x421   :  { %687 = vsyncpa [#allocation12], 1 }
 0x422   :  { %688 = vsyncpa [#allocation4], 1 }
 0x423   :  { %689 = vsyncpa [#allocation15], 1 }

</bundles_post_ra>
